<compile_context>
chip_gen: v7x
topology: tpu7x:2x2x1
jax: 0.10.0
libtpu: 0.0.40
codegen_flags: <defaults>
</compile_context>

<pallas_src>
import math

import jax
import jax.numpy as jnp
from jax.experimental import pallas as pl
from jax.experimental.pallas import tpu as pltpu

# Small synthetic config (consistent with the WavLM module's __init__)
HIDDEN = 32            # config.hidden_size
KERNEL = 16            # config.num_conv_pos_embeddings
GROUPS = 4             # config.num_conv_pos_embedding_groups
PAD = KERNEL // 2
UNPAD_RIGHT = 1 if KERNEL % 2 == 0 else 0
CG = HIDDEN // GROUPS  # channels per group (both in and out)
KC = KERNEL * CG       # per-group im2col contraction = 128 (all real, no zeros)
C_PAD = 128            # lane-dense padding of the output/N axis only


def matmul_bias_gelu_kernel(x_ref, w_ref, b_ref, o_ref):
    """Fused im2col-matmul + bias + exact GELU for the whole (tiny) problem.

    x_ref: (M, KC)      bf16  im2col rows, M = GROUPS*B*T_out (groups folded into M)
    w_ref: (KC, C_PAD)  bf16  packed weight; real N = HIDDEN, lane-padded to 128
    b_ref: (1, C_PAD)   f32   conv bias (zero-padded channels)
    o_ref: (M, C_PAD)   f32   pre-selection output rows (lane-dense stores)
    """
    # Single full MXU tile, f32 accumulation.
    acc = jnp.dot(x_ref[...], w_ref[...], preferred_element_type=jnp.float32)
    acc = acc + b_ref[...]
    # exact (erf-based) GELU == torch.nn.functional.gelu default
    out = 0.5 * acc * (1.0 + jax.lax.erf(acc * (1.0 / math.sqrt(2.0))))
    o_ref[...] = out.astype(o_ref.dtype)


def wavlm_pos_conv_embedding(hidden_states, weight, bias):
    """hidden_states: (B, C, 1, T) as fed to F.conv2d in the PyTorch module.

    weight: (C_out, C_in_per_group, K) -- already weight-norm normalized.
    bias:   (C_out,)
    Returns (B, C, 1, T) to match the PyTorch forward output.
    """
    B, C, one, T = hidden_states.shape
    assert one == 1 and C == HIDDEN

    t_pad = T + 2 * PAD
    t_out = t_pad - KERNEL + 1 - UNPAD_RIGHT                       # == T for even K
    m_rows = GROUPS * B * t_out                                    # 128 here

    # ---- activation repack (XLA side): group-into-M im2col, cast to bf16 ----
    # xg[b, g, ci, t] = hidden_states[b, g*CG + ci, 0, t]
    xg = hidden_states[:, :, 0, :].reshape(B, GROUPS, CG, T)
    xg = jnp.pad(xg, ((0, 0), (0, 0), (0, 0), (PAD, PAD)))         # (B,G,CG,T_pad)
    # slabs[k, b, g, ci, t] = xg[b, g, ci, t + k]
    slabs = jnp.stack([xg[..., k:k + t_out] for k in range(KERNEL)], axis=0)
    # rows ordered (g, b, t); lanes ordered (k, ci) -> (M, KC), KC == 128
    xu = jnp.transpose(slabs, (2, 1, 4, 0, 3)).reshape(m_rows, KC)
    xu = xu.astype(jnp.bfloat16)

    # ---- weight repack: (C_out, CG_in, K) -> (K*CG, C_out), pad N only ----
    w_packed = jnp.transpose(weight, (2, 1, 0)).reshape(KC, HIDDEN)
    w_packed = jnp.pad(w_packed, ((0, 0), (0, C_PAD - HIDDEN))).astype(jnp.bfloat16)
    b_pad = jnp.pad(bias, (0, C_PAD - HIDDEN)).reshape(1, C_PAD).astype(jnp.float32)

    # TODO(synk): at production WavLM sizes (C=768, groups=16, K=128, long T)
    # keep this same (K*CG, C_pad) per-group weight, tile T on the grid with a
    # (K-1)-row overlapped input window and an in-kernel K-tap accumulate (no
    # wrapper-side im2col blowup), keep the weight VMEM-resident via its
    # constant index_map (+ pl.Buffered(1)), mark the T/B axes "parallel" for
    # the v7x megacore, and budget tiles for v7x's 64 MiB VMEM (~24-28 MiB).
    out = pl.pallas_call(
        matmul_bias_gelu_kernel,
        out_shape=jax.ShapeDtypeStruct((m_rows, C_PAD), jnp.float32),
        grid=(1,),                                   # single step: whole problem is one MXU tile
        in_specs=[
            pl.BlockSpec((m_rows, KC), lambda i: (0, 0)),
            pl.BlockSpec((KC, C_PAD), lambda i: (0, 0)),     # constant map -> DMA'd once
            pl.BlockSpec((1, C_PAD), lambda i: (0, 0)),
        ],
        out_specs=pl.BlockSpec((m_rows, C_PAD), lambda i: (0, 0)),
        compiler_params=pltpu.CompilerParams(
            dimension_semantics=("arbitrary",)),
    )(xu, w_packed, b_pad)

    # ---- group-diagonal selection (XLA side): rows of group g keep columns
    #      g*CG:(g+1)*CG; cross-group columns and padded lanes are dropped.
    blocks = [out[g * B * t_out:(g + 1) * B * t_out, g * CG:(g + 1) * CG]
              for g in range(GROUPS)]                             # each (B*T_out, CG)
    sel = jnp.stack(blocks, axis=0).reshape(GROUPS, B, t_out, CG)  # (G,B,T,CG)
    out_bct = jnp.transpose(sel, (1, 0, 3, 2)).reshape(B, HIDDEN, t_out)
    return out_bct[:, :, None, :]                                  # (B, C, 1, T)


def reference(hidden_states, weight, bias):
    """Pure-JAX f32 reference matching the PyTorch forward."""
    x1d = hidden_states[:, :, 0, :]                                # (B, C, T)
    out = jax.lax.conv_general_dilated(
        x1d, weight, window_strides=(1,), padding=[(PAD, PAD)],
        dimension_numbers=('NCH', 'OIH', 'NCH'),
        feature_group_count=GROUPS,
        precision=jax.lax.Precision.HIGHEST)
    out = out + bias[None, :, None]
    if UNPAD_RIGHT > 0:
        out = out[..., :-UNPAD_RIGHT]
    out = 0.5 * out * (1.0 + jax.lax.erf(out / jnp.sqrt(2.0)))
    return out[:, :, None, :]


if __name__ == "__main__":
    key = jax.random.PRNGKey(0)
    k1, k2, k3, k4 = jax.random.split(key, 4)

    B, T = 2, 16
    hidden_states = jax.random.normal(k1, (B, HIDDEN, 1, T), jnp.float32)

    # Deterministic weight-norm parameters (dim=2): w = g * v / ||v||_{dims 0,1}
    weight_v = jax.random.normal(k2, (HIDDEN, CG, KERNEL), jnp.float32) * 0.1
    weight_g = jax.random.normal(k3, (1, 1, KERNEL), jnp.float32) * 0.5 + 1.0
    bias = jax.random.normal(k4, (HIDDEN,), jnp.float32) * 0.1
    v_norm = jnp.sqrt(jnp.sum(weight_v ** 2, axis=(0, 1), keepdims=True))
    weight = weight_g * weight_v / v_norm          # (C_out, C_in_per_group, K)

    out = wavlm_pos_conv_embedding(hidden_states, weight, bias)
    out = jax.block_until_ready(out)

    ref = reference(hidden_states, weight, bias)
    assert out.shape == ref.shape == (B, HIDDEN, 1, T), (out.shape, ref.shape)
    max_err = float(jnp.max(jnp.abs(out - ref)))
    # bf16 MXU operands with f32 accumulation: tolerance sized for bf16 rounding
    # of the 128-term contraction (measured error ~5e-3 worst-case bound ~2e-2).
    assert jnp.allclose(out, ref, rtol=2e-2, atol=2e-2), max_err

    print("KERNEL_OK")
</pallas_src>

<mosaic_0001>
module attributes {stable_mosaic.version = 11 : i64} {
  func.func @matmul_bias_gelu_kernel(%arg0: i32, %arg1: memref<128x128xbf16, #tpu.memory_space<vmem>>, %arg2: memref<128x128xbf16, #tpu.memory_space<vmem>>, %arg3: memref<1x128xf32, #tpu.memory_space<vmem>>, %arg4: memref<128x128xf32, #tpu.memory_space<vmem>>) attributes {dimension_semantics = [#tpu.dimension_semantics<arbitrary>], iteration_bounds = array<i64: 1>, scalar_prefetch = 0 : i64, scratch_operands = 0 : i64, tpu.core_type = #tpu.core_type<tc>, window_params = [{pipeline_mode = #tpu.pipeline_mode<synchronous>, transform_indices = @transform_0, window_bounds = array<i64: 128, 128>}, {pipeline_mode = #tpu.pipeline_mode<synchronous>, transform_indices = @transform_1, window_bounds = array<i64: 128, 128>}, {pipeline_mode = #tpu.pipeline_mode<synchronous>, transform_indices = @transform_2, window_bounds = array<i64: 1, 128>}, {pipeline_mode = #tpu.pipeline_mode<synchronous>, transform_indices = @transform_3, window_bounds = array<i64: 128, 128>}]} {
    %c0 = arith.constant 0 : index
    %c0_0 = arith.constant 0 : index
    %0 = vector.load %arg1[%c0, %c0_0] : memref<128x128xbf16, #tpu.memory_space<vmem>>, vector<128x128xbf16>
    %c0_1 = arith.constant 0 : index
    %c0_2 = arith.constant 0 : index
    %1 = vector.load %arg2[%c0_1, %c0_2] : memref<128x128xbf16, #tpu.memory_space<vmem>>, vector<128x128xbf16>
    %cst = arith.constant dense<0.000000e+00> : vector<128x128xf32>
    %2 = tpu.matmul %0, %1, %cst {dimension_numbers = #tpu.dot_dimension_numbers<[1], [0], [0], [1], [0, 0, 1, 1], [], []>} : vector<128x128xbf16>, vector<128x128xbf16>, vector<128x128xf32> -> vector<128x128xf32>
    %c0_3 = arith.constant 0 : index
    %c0_4 = arith.constant 0 : index
    %3 = vector.load %arg3[%c0_3, %c0_4] : memref<1x128xf32, #tpu.memory_space<vmem>>, vector<1x128xf32>
    %4 = vector.broadcast %3 : vector<1x128xf32> to vector<128x128xf32>
    %5 = arith.addf %2, %4 : vector<128x128xf32>
    %cst_5 = arith.constant 5.000000e-01 : f32
    %6 = vector.broadcast %cst_5 : f32 to vector<128x128xf32>
    %7 = arith.mulf %6, %5 : vector<128x128xf32>
    %cst_6 = arith.constant 0.707106769 : f32
    %8 = vector.broadcast %cst_6 : f32 to vector<128x128xf32>
    %9 = arith.mulf %5, %8 : vector<128x128xf32>
    %10 = math.erf %9 : vector<128x128xf32>
    %cst_7 = arith.constant 1.000000e+00 : f32
    %11 = vector.broadcast %cst_7 : f32 to vector<128x128xf32>
    %12 = arith.addf %11, %10 : vector<128x128xf32>
    %13 = arith.mulf %7, %12 : vector<128x128xf32>
    %c0_8 = arith.constant 0 : index
    %c0_9 = arith.constant 0 : index
    %14 = vector.load %arg4[%c0_8, %c0_9] : memref<128x128xf32, #tpu.memory_space<vmem>>, vector<128x128xf32>
    tpu.vector_store %arg4[%c0_8, %c0_9], %13 {strides = array<i32>} : memref<128x128xf32, #tpu.memory_space<vmem>>, vector<128x128xf32>,
    return
  }
  func.func @transform_0(%arg0: i32) -> (i32, i32) {
    %c0_i32 = arith.constant 0 : i32
    %c0_i32_0 = arith.constant 0 : i32
    %c0_i32_1 = arith.constant 0 : i32
    return %c0_i32, %c0_i32_0 : i32, i32
  }
  func.func @transform_1(%arg0: i32) -> (i32, i32) {
    %c0_i32 = arith.constant 0 : i32
    %c0_i32_0 = arith.constant 0 : i32
    %c0_i32_1 = arith.constant 0 : i32
    return %c0_i32, %c0_i32_0 : i32, i32
  }
  func.func @transform_2(%arg0: i32) -> (i32, i32) {
    %c0_i32 = arith.constant 0 : i32
    %c0_i32_0 = arith.constant 0 : i32
    %c0_i32_1 = arith.constant 0 : i32
    return %c0_i32, %c0_i32_0 : i32, i32
  }
  func.func @transform_3(%arg0: i32) -> (i32, i32) {
    %c0_i32 = arith.constant 0 : i32
    %c0_i32_0 = arith.constant 0 : i32
    %c0_i32_1 = arith.constant 0 : i32
    return %c0_i32, %c0_i32_0 : i32, i32
  }
}

</mosaic_0001>

<bundles_post_ra>
// kernel: tpu_custom_call.1
= control target key start
LH: loop header
LB: loop body
LE: loop exit
PB: predicated region body
PF: predicated region fallthrough
CT: control target
= control target key end

     0   :  { %8 = vsyncpa [#allocation3], 0  ;;  %s708_s0 = inlined_call_operand.hbm [shape: bf16[128,128], index: 0, kind: input, shape index: {}]   ;;  %s709_s1 = inlined_call_operand.hbm [shape: bf16[128,128], index: 1, kind: input, shape index: {}]   ;;  %s710_s2 = inlined_call_operand.vmem [shape: f32[1,128], index: 2, kind: input, shape index: {}]   ;;  %s711_s3 = inlined_call_operand.hbm [shape: f32[128,128], index: 3, kind: output, shape index: {}]  }
   0x1   :  { %9 = vsyncpa [#allocation6], 0 }
   0x2   :  { %10 = vsyncpa [#allocation4], 0  ;;  %s598_s12 = smov [#allocation2]   ;;  %s526_s16 = scalar_lea.hbm %s708_s0, 1024 }
   0x3   :  { %s16_s13 = sshll.u32 %s598_s12, 4  ;;  %p527_p0 = scmp.ne.s32.totalorder %s708_s0, %s526_s16  ;;  %s17_s13 = int_to_ptr.vmem [resolvable:$true] %s16_s13 }
   0x4   :  { %p530_p1 = scmp.lt.u32.totalorder %s526_s16, %s708_s0 }
   0x6   :  { %p532_p2 = pnand %p530_p1, %p527_p0 }
   0x8   :  { %535 = shalt.err (!%p532_p2)
}
   0x9   :  { %s536_s21 = scalar_lea.vmem %s17_s13, 1024  ;;  %p541_p4 = scmp.lt.s32.totalorder %s17_s13, %s17_s13 }
   0xa   :  { %p537_p3 = scmp.ne.s32.totalorder %s17_s13, %s536_s21  ;;  %p542_p5 = scmp.lt.s32.totalorder %s536_s21, %s536_s21 }
   0xc   :  { %p543_p6 = por %p542_p5, %p541_p4 }
   0xe   :  { %p544_p7 = pnand %p543_p6, %p537_p3 }
  0x10   :  { %547 = shalt.err (!%p544_p7)
}
  0x11   :  { %s599_s22 = smov 64   ;;  %s600_s23 = smov 4  }
  0x12   :  { %22 = dma.hbm_to_vmem [thread:$0]  %s708_s0, 1024, %s17_s13, [#allocation3], %s599_s22, %s599_s22, %s600_s23  }
  0x13   :  { %s601_s26 = smov [#allocation5]   ;;  %s548_s30 = scalar_lea.hbm %s709_s1, 1024 }
  0x14   :  { %s28_s27 = sshll.u32 %s601_s26, 4  ;;  %p549_p8 = scmp.ne.s32.totalorder %s709_s1, %s548_s30  ;;  %s29_s27 = int_to_ptr.vmem [resolvable:$true] %s28_s27 }
  0x15   :  { %p552_p9 = scmp.lt.u32.totalorder %s548_s30, %s709_s1 }
  0x17   :  { %p554_p10 = pnand %p552_p9, %p549_p8 }
  0x19   :  { %557 = shalt.err (!%p554_p10)
}
  0x1a   :  { %s558_s8 = scalar_lea.vmem %s29_s27, 1024  ;;  %p563_p12 = scmp.lt.s32.totalorder %s29_s27, %s29_s27 }
  0x1b   :  { %p559_p11 = scmp.ne.s32.totalorder %s29_s27, %s558_s8  ;;  %p564_p13 = scmp.lt.s32.totalorder %s558_s8, %s558_s8 }
  0x1d   :  { %p565_p0 = por %p564_p13, %p563_p12 }
  0x1f   :  { %p566_p1 = pnand %p565_p0, %p559_p11 }
  0x21   :  { %569 = shalt.err (!%p566_p1)
}
  0x22   :  { %34 = dma.hbm_to_vmem [thread:$0]  %s709_s1, 1024, %s29_s27, [#allocation6], %s599_s22, %s599_s22, %s600_s23  }
  0x23   :  { %592 = dma.done.wait [#allocation3], 1024  }
  0x24   :  { %593 = vsyncadd [#allocation3], 4294966272 }
  0x25   :  { %594 = dma.done.wait [#allocation6], 1024  }
  0x26   :  { %595 = vsyncadd [#allocation6], 4294966272  ;;  %v478_v0 = vld [vmem:[#allocation5] sm:$0xff]   ;;  %v479_v1 = vld [vmem:[#allocation5 + $0x8] sm:$0xff]  }
  0x27   :  { %423 = vmatprep.subr.bf16.mxu0 %v478_v0  ;;  %455 = vmatprep.subr.bf16.mxu1 %v478_v0  ;;  %v480_v2 = vld [vmem:[#allocation5 + $0x10] sm:$0xff]   ;;  %v481_v3 = vld [vmem:[#allocation5 + $0x18] sm:$0xff]   ;;  %v486_v4 = vld [vmem:[#allocation2] sm:$0xff]  }
  0x28   :  { %424 = vmatpush3.bf16.msra.mxu0 %v478_v0  ;;  %463 = vmatpush3.bf16.msra.mxu1 %v478_v0  ;;  %v487_v5 = vld [vmem:[#allocation2 + $0x20] sm:$0xff]   ;;  %v483_v7 = vld [vmem:[#allocation5 + $0x28] sm:$0xff]   ;;  %v484_v8 = vld [vmem:[#allocation5 + $0x30] sm:$0xff]  }
  0x29   :  { %425 = vmatprep.subr.bf16.mxu0 %v479_v1  ;;  %456 = vmatprep.subr.bf16.mxu1 %v479_v1  ;;  %v482_v6 = vld [vmem:[#allocation5 + $0x20] sm:$0xff]   ;;  %v485_v9 = vld [vmem:[#allocation5 + $0x38] sm:$0xff]   ;;  %v488_v10 = vld [vmem:[#allocation2 + $0x8] sm:$0xff]  }
  0x2a   :  { %439 = vmatprep.mubr.bf16.mxu0 %v486_v4  ;;  %447 = vmatprep.mubr.bf16.mxu1 %v487_v5  ;;  %v489_v11 = vld [vmem:[#allocation2 + $0x28] sm:$0xff]   ;;  %v490_v12 = vld [vmem:[#allocation2 + $0x10] sm:$0xff]   ;;  %v492_v14 = vld [vmem:[#allocation2 + $0x18] sm:$0xff]  }
  0x2b   :  { %v491_v13 = vld [vmem:[#allocation2 + $0x30] sm:$0xff]   ;;  %v493_v15 = vld [vmem:[#allocation2 + $0x38] sm:$0xff]   ;;  %v390_v16 = vld [vmem:[%s710_s2] ss:$0 sm:$0xff]  ;;  %s602_s2 = smov [#allocation7]  }
  0x2c   :  { %426 = vmatpush3.bf16.msra.mxu0 %v479_v1  ;;  %464 = vmatpush3.bf16.msra.mxu1 %v479_v1  ;;  %s377_s11 = sshll.u32 %s602_s2, 4  ;;  %s378_s11 = int_to_ptr.vmem [resolvable:$true] %s377_s11 }
  0x2d   :  { %427 = vmatprep.subr.bf16.mxu0 %v480_v2  ;;  %457 = vmatprep.subr.bf16.mxu1 %v480_v2  ;;  %s570_s12 = scalar_lea.vmem %s378_s11, 2048  ;;  %p575_p3 = scmp.lt.s32.totalorder %s378_s11, %s378_s11 }
  0x2e   :  { %p571_p2 = scmp.ne.s32.totalorder %s378_s11, %s570_s12  ;;  %p576_p4 = scmp.lt.s32.totalorder %s570_s12, %s570_s12 }
  0x30   :  { %428 = vmatpush3.bf16.msra.mxu0 %v480_v2  ;;  %465 = vmatpush3.bf16.msra.mxu1 %v480_v2  ;;  %p577_p5 = por %p576_p4, %p575_p3 }
  0x31   :  { %429 = vmatprep.subr.bf16.mxu0 %v481_v3  ;;  %458 = vmatprep.subr.bf16.mxu1 %v481_v3 }
  0x32   :  { %p578_p6 = pnand %p577_p5, %p571_p2 }
  0x34   :  { %430 = vmatpush3.bf16.msra.mxu0 %v481_v3  ;;  %466 = vmatpush3.bf16.msra.mxu1 %v481_v3 }
  0x35   :  { %431 = vmatprep.subr.bf16.mxu0 %v482_v6  ;;  %459 = vmatprep.subr.bf16.mxu1 %v482_v6 }
  0x38   :  { %432 = vmatpush3.bf16.msra.mxu0 %v482_v6  ;;  %467 = vmatpush3.bf16.msra.mxu1 %v482_v6 }
  0x39   :  { %433 = vmatprep.subr.bf16.mxu0 %v483_v7  ;;  %460 = vmatprep.subr.bf16.mxu1 %v483_v7 }
  0x3c   :  { %434 = vmatpush3.bf16.msra.mxu0 %v483_v7  ;;  %468 = vmatpush3.bf16.msra.mxu1 %v483_v7 }
  0x3d   :  { %435 = vmatprep.subr.bf16.mxu0 %v484_v8  ;;  %461 = vmatprep.subr.bf16.mxu1 %v484_v8 }
  0x40   :  { %436 = vmatpush3.bf16.msra.mxu0 %v484_v8  ;;  %469 = vmatpush3.bf16.msra.mxu1 %v484_v8 }
  0x41   :  { %437 = vmatprep.subr.bf16.mxu0 %v485_v9  ;;  %462 = vmatprep.subr.bf16.mxu1 %v485_v9 }
  0x44   :  { %438 = vmatpush3.bf16.msra.mxu0 %v485_v9  ;;  %470 = vmatpush3.bf16.msra.mxu1 %v485_v9 }
  0x47   :  { %440 = vmatmul.mubr.bf16.vlgmr.msra.gmra.mrb[0].mxu0 %v488_v10  ;;  %448 = vmatmul.mubr.bf16.vlgmr.msra.gmra.mrb[0].mxu1 %v489_v11 }
  0x48   :  { %443 = vmatprep.mubr.bf16.mxu0 %v490_v12  ;;  %451 = vmatprep.mubr.bf16.mxu1 %v491_v13 }
  0x4f   :  { %444 = vmatmul.mubr.bf16.gmra.mrb[4].mxu0 %v492_v14  ;;  %452 = vmatmul.mubr.bf16.gmra.mrb[4].mxu1 %v493_v15 }
 0x11a   :  { %v441_v17 = vpop.f32.mrb[0].mxu0  ;;  %v449_v18 = vpop.f32.mrb[0].mxu1 }
 0x11b   :  { %v222_v19 = vadd.f32 %v441_v17, %v390_v16  ;;  %v254_v20 = vadd.f32 %v449_v18, %v390_v16  ;;  %v213_v21 = vpop.f32.mrb[1].mxu0  ;;  %v245_v22 = vpop.f32.mrb[1].mxu1 }
 0x11c   :  { %v214_v23 = vadd.f32 %v390_v16, %v213_v21  ;;  %v246_v24 = vadd.f32 %v390_v16, %v245_v22  ;;  %v442_v25 = vpop.f32.mrb[2].mxu0  ;;  %v450_v26 = vpop.f32.mrb[2].mxu1 }
 0x11d   :  { %v294_v27 = vmul.f32 0.70710677, %v222_v19  ;;  %v302_v28 = vmul.f32 0.70710677, %v254_v20  ;;  %v225_v31 = vadd.f32 %v442_v25, %v390_v16  ;;  %v652_v32 = vadd.f32 %v450_v26, %v390_v16  ;;  %v216_v33 = vpop.f32.mrb[3].mxu0  ;;  %v248_v34 = vpop.f32.mrb[3].mxu1 }
 0x11e   :  { %v292_v29 = vmul.f32 0.70710677, %v214_v23  ;;  %v300_v30 = vmul.f32 0.70710677, %v246_v24  ;;  %v654_v35 = vadd.f32 %v390_v16, %v216_v33  ;;  %v656_v36 = vadd.f32 %v390_v16, %v248_v34 }
 0x11f   :  { %494 = verf.f32 %v294_v27  ;;  %v295_v37 = vmul.f32 0.70710677, %v225_v31  ;;  %v303_v38 = vmul.f32 0.70710677, %v652_v32  ;;  %v278_v61 = vmul.f32 0.5, %v222_v19 }
 0x120   :  { %496 = verf.f32 %v302_v28  ;;  %v293_v39 = vmul.f32 0.70710677, %v654_v35  ;;  %v301_v41 = vmul.f32 0.70710677, %v656_v36  ;;  %v286_v62 = vmul.f32 0.5, %v254_v20 }
 0x121   :  { %498 = verf.f32 %v292_v29  ;;  %v276_v5 = vmul.f32 0.5, %v214_v23  ;;  %v284_v6 = vmul.f32 0.5, %v246_v24  ;;  %v279_v15 = vmul.f32 0.5, %v225_v31 }
 0x122   :  { %500 = verf.f32 %v300_v30  ;;  %v445_v40 = vpop.f32.mrb[4].mxu0  ;;  %v453_v43 = vpop.f32.mrb[4].mxu1  ;;  %v287_v22 = vmul.f32 0.5, %v652_v32  ;;  %v277_v26 = vmul.f32 0.5, %v654_v35  ;;  %v285_v30 = vmul.f32 0.5, %v656_v36 }
 0x123   :  { %502 = verf.f32 %v295_v37  ;;  %v661_v42 = vadd.f32 %v445_v40, %v390_v16  ;;  %v229_v44 = vpop.f32.mrb[5].mxu0  ;;  %v663_v45 = vadd.f32 %v453_v43, %v390_v16  ;;  %v261_v47 = vpop.f32.mrb[5].mxu1 }
 0x124   :  { %504 = verf.f32 %v303_v38  ;;  %v665_v46 = vadd.f32 %v390_v16, %v229_v44  ;;  %v446_v48 = vpop.f32.mrb[6].mxu0  ;;  %v668_v50 = vadd.f32 %v390_v16, %v261_v47  ;;  %v454_v51 = vpop.f32.mrb[6].mxu1 }
 0x125   :  { %506 = verf.f32 %v293_v39  ;;  %v298_v49 = vmul.f32 0.70710677, %v661_v42  ;;  %v232_v52 = vpop.f32.mrb[7].mxu0  ;;  %v306_v53 = vmul.f32 0.70710677, %v663_v45  ;;  %v264_v54 = vpop.f32.mrb[7].mxu1  ;;  %v673_v57 = vadd.f32 %v446_v48, %v390_v16 }
 0x126   :  { %508 = verf.f32 %v301_v41  ;;  %v296_v55 = vmul.f32 0.70710677, %v665_v46  ;;  %v304_v56 = vmul.f32 0.70710677, %v668_v50  ;;  %v675_v58 = vadd.f32 %v454_v51, %v390_v16 }
 0x127   :  { %510 = verf.f32 %v298_v49  ;;  %v677_v59 = vadd.f32 %v390_v16, %v232_v52  ;;  %v299_v1 = vmul.f32 0.70710677, %v673_v57  ;;  %v680_v2 = vadd.f32 %v390_v16, %v264_v54 }
 0x128   :  { %512 = verf.f32 %v306_v53  ;;  %v307_v7 = vmul.f32 0.70710677, %v675_v58  ;;  %v282_v37 = vmul.f32 0.5, %v661_v42  ;;  %v290_v40 = vmul.f32 0.5, %v663_v45 }
 0x129   :  { %v495_v60 = vpop.eup %494  ;;  %514 = verf.f32 %v296_v55  ;;  %v297_v11 = vmul.f32 0.70710677, %v677_v59  ;;  %v305_v19 = vmul.f32 0.70710677, %v680_v2  ;;  %v280_v44 = vmul.f32 0.5, %v665_v46 }
 0x12a   :  { %v497_v63 = vpop.eup %496  ;;  %v326_v0 = vadd.f32 1.0, %v495_v60  ;;  %516 = verf.f32 %v304_v56  ;;  %v288_v48 = vmul.f32 0.5, %v668_v50  ;;  %v283_v45 = vmul.f32 0.5, %v673_v57 }
 0x12b   :  { %v499_v3 = vpop.eup %498  ;;  %v334_v4 = vadd.f32 1.0, %v497_v63  ;;  %518 = verf.f32 %v299_v1  ;;  %v291_v56 = vmul.f32 0.5, %v675_v58  ;;  %v289_v1 = vmul.f32 0.5, %v680_v2 }
 0x12c   :  { %v501_v8 = vpop.eup %500  ;;  %v342_v9 = vmul.f32 %v326_v0, %v278_v61  ;;  %v324_v10 = vadd.f32 1.0, %v499_v3  ;;  %520 = verf.f32 %v307_v7  ;;  %v281_v61 = vmul.f32 0.5, %v677_v59 }
 0x12d   :  { %v503_v12 = vpop.eup %502  ;;  %v350_v13 = vmul.f32 %v334_v4, %v286_v62  ;;  %v332_v14 = vadd.f32 1.0, %v501_v8  ;;  %522 = verf.f32 %v297_v11 }
 0x12e   :  { %v505_v17 = vpop.eup %504  ;;  %358 = vst [vmem:[#allocation7 + $0x10] sm:$0xff] %v342_v9  ;;  %v340_v16 = vmul.f32 %v324_v10, %v276_v5  ;;  %v327_v18 = vadd.f32 1.0, %v503_v12  ;;  %524 = verf.f32 %v305_v19 }
 0x12f   :  { %v507_v20 = vpop.eup %506  ;;  %366 = vst [vmem:[#allocation7 + $0x50] sm:$0xff] %v350_v13  ;;  %v348_v21 = vmul.f32 %v332_v14, %v284_v6  ;;  %v335_v23 = vadd.f32 1.0, %v505_v17 }
 0x130   :  { %v509_v24 = vpop.eup %508  ;;  %356 = vst [vmem:[#allocation7] sm:$0xff] %v340_v16  ;;  %v343_v25 = vmul.f32 %v327_v18, %v279_v15  ;;  %v325_v27 = vadd.f32 1.0, %v507_v20 }
 0x131   :  { %v511_v28 = vpop.eup %510  ;;  %364 = vst [vmem:[#allocation7 + $0x40] sm:$0xff] %v348_v21  ;;  %v351_v29 = vmul.f32 %v335_v23, %v287_v22  ;;  %v333_v31 = vadd.f32 1.0, %v509_v24 }
 0x132   :  { %v513_v33 = vpop.eup %512  ;;  %359 = vst [vmem:[#allocation7 + $0x18] sm:$0xff] %v343_v25  ;;  %v341_v34 = vmul.f32 %v325_v27, %v277_v26  ;;  %v330_v32 = vadd.f32 1.0, %v511_v28 }
 0x133   :  { %v515_v38 = vpop.eup %514  ;;  %367 = vst [vmem:[#allocation7 + $0x58] sm:$0xff] %v351_v29  ;;  %v349_v39 = vmul.f32 %v333_v31, %v285_v30  ;;  %v338_v35 = vadd.f32 1.0, %v513_v33 }
 0x134   :  { %v517_v41 = vpop.eup %516  ;;  %357 = vst [vmem:[#allocation7 + $0x8] sm:$0xff] %v341_v34  ;;  %v346_v43 = vmul.f32 %v330_v32, %v282_v37  ;;  %v328_v47 = vadd.f32 1.0, %v515_v38 }
 0x135   :  { %365 = vst [vmem:[#allocation7 + $0x48] sm:$0xff] %v349_v39  ;;  %v354_v36 = vmul.f32 %v338_v35, %v290_v40  ;;  %v336_v49 = vadd.f32 1.0, %v517_v41  ;;  %v519_v51 = vpop.eup %518 }
 0x136   :  { %362 = vst [vmem:[#allocation7 + $0x30] sm:$0xff] %v346_v43  ;;  %v344_v42 = vmul.f32 %v328_v47, %v280_v44  ;;  %v521_v52 = vpop.eup %520  ;;  %v331_v54 = vadd.f32 1.0, %v519_v51 }
 0x137   :  { %370 = vst [vmem:[#allocation7 + $0x70] sm:$0xff] %v354_v36  ;;  %v352_v53 = vmul.f32 %v336_v49, %v288_v48  ;;  %v523_v55 = vpop.eup %522  ;;  %v339_v46 = vadd.f32 1.0, %v521_v52 }
 0x138   :  { %360 = vst [vmem:[#allocation7 + $0x20] sm:$0xff] %v344_v42  ;;  %v347_v60 = vmul.f32 %v331_v54, %v283_v45  ;;  %v329_v50 = vadd.f32 1.0, %v523_v55  ;;  %v525_v62 = vpop.eup %524 }
 0x139   :  { %368 = vst [vmem:[#allocation7 + $0x60] sm:$0xff] %v352_v53  ;;  %v355_v63 = vmul.f32 %v339_v46, %v291_v56  ;;  %v337_v57 = vadd.f32 1.0, %v525_v62 }
 0x13a   :  { %363 = vst [vmem:[#allocation7 + $0x38] sm:$0xff] %v347_v60  ;;  %v345_v0 = vmul.f32 %v329_v50, %v281_v61 }
 0x13b   :  { %371 = vst [vmem:[#allocation7 + $0x78] sm:$0xff] %v355_v63  ;;  %v353_v3 = vmul.f32 %v337_v57, %v289_v1 }
 0x13c   :  { %361 = vst [vmem:[#allocation7 + $0x28] sm:$0xff] %v345_v0 }
 0x13d   :  { %369 = vst [vmem:[#allocation7 + $0x68] sm:$0xff] %v353_v3 }
 0x13e   :  { %581 = shalt.err (!%p578_p6)
}
 0x13f   :  { %s582_s15 = scalar_lea.hbm %s711_s3, 2048 }
 0x140   :  { %p583_p7 = scmp.ne.s32.totalorder %s711_s3, %s582_s15  ;;  %p586_p8 = scmp.lt.u32.totalorder %s582_s15, %s711_s3 }
 0x142   :  { %p588_p9 = pnand %p586_p8, %p583_p7 }
 0x144   :  { %591 = shalt.err (!%p588_p9)
}
 0x145   :  { %s603_s20 = smov 128   ;;  %s604_s21 = smov 8  }
 0x146   :  { %383 = dma.vmem_to_hbm [thread:$0]  %s378_s11, 2048, %s711_s3, [#allocation4], %s603_s20, %s603_s20, %s604_s21  }
 0x147   :  { %596 = dma.done.wait [#allocation4], 2048  }
 0x148   :  { %597 = vsyncadd [#allocation4], 4294965248 }
 0x149   :  { %387 = vsyncpa [#allocation3], 1 }
 0x14a   :  { %388 = vsyncpa [#allocation6], 1 }
 0x14b   :  { %389 = vsyncpa [#allocation4], 1 }

</bundles_post_ra>
